<compile_context>
chip_gen: v5e
topology: v5e:2x2
jax: 0.10.0
libtpu: 0.0.40
codegen_flags: <defaults>
</compile_context>

<pallas_src>
import math
import functools

import jax
import jax.numpy as jnp
from jax import lax
from jax.experimental import pallas as pl
from jax.experimental.pallas import tpu as pltpu


# ----------------------------------------------------------------------------
# Parameter (buffer) setup: sinusoidal table P, computed in plain JAX (glue).
# ----------------------------------------------------------------------------
def make_positional_table(num_hiddens: int, max_len: int = 1000) -> jnp.ndarray:
    pos = jnp.arange(max_len, dtype=jnp.float32).reshape(-1, 1)
    div = jnp.power(
        10000.0, jnp.arange(0, num_hiddens, 2, dtype=jnp.float32) / num_hiddens
    )
    X = pos / div                                   # (max_len, ceil(H/2))
    P = jnp.zeros((1, max_len, num_hiddens), dtype=jnp.float32)
    P = P.at[:, :, 0::2].set(jnp.sin(X)[None, :, : (num_hiddens + 1) // 2])
    P = P.at[:, :, 1::2].set(jnp.cos(X)[None, :, : num_hiddens // 2])
    return P


# ----------------------------------------------------------------------------
# Pallas kernel: elementwise add of positional table + (optional) dropout.
#   x_ref: (B, TC) tile of the flattened (B, S*H) activations
#   p_ref: (1, TC) tile of the flattened positional table (broadcast over B)
# ----------------------------------------------------------------------------
def pe_kernel(seed_ref, x_ref, p_ref, o_ref, *, rate: float, training: bool,
              total_cols: int):
    # Do math in f32 regardless of activation dtype (v5e has no bf16 VPU path).
    y = x_ref[...].astype(jnp.float32) + p_ref[...].astype(jnp.float32)

    if training and rate > 0.0:
        # Inverted dropout with a counter-based hash RNG (portable: plain
        # integer VPU ops, no pltpu.prng_* — works on TPU and in interpret).
        # TODO(synk): not bit-identical to torch.nn.Dropout's RNG stream
        # (statistically equivalent inverted dropout).
        nrows, ncols = y.shape
        col0 = pl.program_id(0) * ncols
        rows = lax.broadcasted_iota(jnp.int32, (nrows, ncols), 0)
        cols = lax.broadcasted_iota(jnp.int32, (nrows, ncols), 1) + col0
        lin = (rows * total_cols + cols).astype(jnp.uint32)
        seed_u = seed_ref[0].astype(jnp.uint32)

        h = lin * jnp.uint32(0x9E3779B9)
        h = h + (seed_u * jnp.uint32(0x85EBCA6B) + jnp.uint32(0x27D4EB2F))
        h = h ^ (h >> 16)
        h = h * jnp.uint32(0x7FEB352D)
        h = h ^ (h >> 15)
        h = h * jnp.uint32(0x846CA68B)
        h = h ^ (h >> 16)

        # keep iff uniform u32 < (1-rate) * 2^32; the clamp biases keep-prob by
        # at most 2^-32 (negligible, intentional).
        thresh = jnp.uint32(min(int((1.0 - rate) * 4294967296.0), 4294967295))
        keep = h < thresh
        y = jnp.where(keep, y * jnp.float32(1.0 / (1.0 - rate)),
                      jnp.zeros_like(y))

    o_ref[...] = y.astype(o_ref.dtype)


# ----------------------------------------------------------------------------
# Tiling helper: pick a multiple-of-128 column tile that divides F = S*H and
# keeps each (B, TC) x-block around <= 1 MiB (safe on v7x's 64 MiB VMEM with
# double buffering of x / p / out).
# ----------------------------------------------------------------------------
def _choose_col_tile(F: int, B: int, itemsize: int) -> int:
    budget_elems = (1 << 20) // itemsize          # ~1 MiB per x block
    cap = max(128, budget_elems // max(B, 1))
    if F <= cap or F % 128 != 0:
        return F                                  # full row (lane-dense or full-dim)
    best = 128
    t = 128
    while t <= cap:
        if F % t == 0:
            best = t
        t += 128
    return best


# ----------------------------------------------------------------------------
# Wrapper
# ----------------------------------------------------------------------------
def positional_encoding(
    x: jnp.ndarray,
    P: jnp.ndarray,
    *,
    dropout_rate: float = 0.0,
    training: bool = False,
    seed: int = 0,
) -> jnp.ndarray:
    """x: (B, S, H). Returns dropout(x + P[:, :S, :])."""
    B, S, H = x.shape
    F = S * H
    dtype = x.dtype
    itemsize = jnp.dtype(dtype).itemsize

    # Lane-dense 2D views: x -> (B, S*H), P slice -> (1, S*H) in x's dtype.
    x2 = x.reshape(B, F)
    p2 = P[:, :S, :].astype(dtype).reshape(1, F)

    tc = _choose_col_tile(F, B, itemsize)
    grid = (F // tc,)

    seed_arr = jnp.array([seed], dtype=jnp.int32)  # scalar-prefetch arg (SMEM)
    kernel = functools.partial(
        pe_kernel, rate=float(dropout_rate), training=bool(training),
        total_cols=F)

    cost = pl.CostEstimate(
        flops=B * F,                               # one add per element
        transcendentals=0,
        bytes_accessed=(2 * B * F + F) * itemsize, # read x, write y, read P once
    )

    out2 = pl.pallas_call(
        kernel,
        out_shape=jax.ShapeDtypeStruct((B, F), dtype),
        grid_spec=pltpu.PrefetchScalarGridSpec(
            num_scalar_prefetch=1,
            grid=grid,
            in_specs=[
                pl.BlockSpec((B, tc), lambda j, seed: (0, j)),  # x tile
                pl.BlockSpec((1, tc), lambda j, seed: (0, j)),  # P tile (read once)
            ],
            out_specs=pl.BlockSpec((B, tc), lambda j, seed: (0, j)),
        ),
        compiler_params=pltpu.CompilerParams(
            # Counter-based RNG is order independent -> safe to shard across
            # TensorCores on v7x; neutral on v5e/v6e.
            dimension_semantics=("parallel",),
        ),
        cost_estimate=cost,
    )(seed_arr, x2, p2)

    return out2.reshape(B, S, H)


if __name__ == "__main__":
    # Small shapes consistent with the module: batch=2, seq=8, num_hiddens=32.
    B, S, H = 2, 8, 32
    max_len = 1000
    dropout = 0.1

    key = jax.random.PRNGKey(0)
    x = jax.random.normal(key, (B, S, H), dtype=jnp.float32)
    P = make_positional_table(H, max_len)

    # Eval-mode forward (dropout is identity): check against pure-JAX reference.
    y_eval = positional_encoding(x, P, dropout_rate=dropout, training=False)
    y_eval = jax.block_until_ready(y_eval)
    ref = x + P[:, :S, :]
    assert jnp.allclose(y_eval, ref, atol=1e-6), "eval-mode mismatch"

    # Training-mode forward (inverted dropout inside the kernel).
    y_train = positional_encoding(x, P, dropout_rate=dropout, training=True,
                                  seed=42)
    y_train = jax.block_until_ready(y_train)
    assert y_train.shape == (B, S, H)
    # Every element must be either dropped (0) or kept & rescaled by 1/(1-p).
    scaled = ref / (1.0 - dropout)
    ok = jnp.isclose(y_train, 0.0, atol=1e-6) | jnp.isclose(
        y_train, scaled, atol=1e-5)
    assert bool(jnp.all(ok)), "train-mode dropout mismatch"

    print("KERNEL_OK")
</pallas_src>

<mosaic_0001>
module attributes {stable_mosaic.version = 11 : i64} {
  func.func @pe_kernel(%arg0: i32, %arg1: memref<1xi32, #tpu.memory_space<smem>>, %arg2: memref<2x256xf32, #tpu.memory_space<vmem>>, %arg3: memref<1x256xf32, #tpu.memory_space<vmem>>, %arg4: memref<2x256xf32, #tpu.memory_space<vmem>>) attributes {dimension_semantics = [#tpu.dimension_semantics<parallel>], iteration_bounds = array<i64: 1>, scalar_prefetch = 1 : i64, scratch_operands = 0 : i64, tpu.core_type = #tpu.core_type<tc>, window_params = [{transform_indices = @transform_0, window_bounds = array<i64: 2, 256>}, {transform_indices = @transform_1, window_bounds = array<i64: 1, 256>}, {transform_indices = @transform_2, window_bounds = array<i64: 2, 256>}]} {
    %c0 = arith.constant 0 : index
    %c0_0 = arith.constant 0 : index
    %0 = vector.load %arg2[%c0, %c0_0] : memref<2x256xf32, #tpu.memory_space<vmem>>, vector<2x256xf32>
    %c0_1 = arith.constant 0 : index
    %c0_2 = arith.constant 0 : index
    %1 = vector.load %arg3[%c0_1, %c0_2] : memref<1x256xf32, #tpu.memory_space<vmem>>, vector<1x256xf32>
    %2 = vector.broadcast %1 : vector<1x256xf32> to vector<2x256xf32>
    %3 = arith.addf %0, %2 : vector<2x256xf32>
    %c0_3 = arith.constant 0 : index
    %c0_4 = arith.constant 0 : index
    %4 = vector.load %arg4[%c0_3, %c0_4] : memref<2x256xf32, #tpu.memory_space<vmem>>, vector<2x256xf32>
    tpu.vector_store %arg4[%c0_3, %c0_4], %3 {strides = array<i32>} : memref<2x256xf32, #tpu.memory_space<vmem>>, vector<2x256xf32>,
    return
  }
  func.func @transform_0(%arg0: i32, %arg1: memref<1xi32, #tpu.memory_space<smem>>) -> (i32, i32) {
    %c0_i32 = arith.constant 0 : i32
    %c0_i32_0 = arith.constant 0 : i32
    return %c0_i32, %arg0 : i32, i32
  }
  func.func @transform_1(%arg0: i32, %arg1: memref<1xi32, #tpu.memory_space<smem>>) -> (i32, i32) {
    %c0_i32 = arith.constant 0 : i32
    %c0_i32_0 = arith.constant 0 : i32
    return %c0_i32, %arg0 : i32, i32
  }
  func.func @transform_2(%arg0: i32, %arg1: memref<1xi32, #tpu.memory_space<smem>>) -> (i32, i32) {
    %c0_i32 = arith.constant 0 : i32
    %c0_i32_0 = arith.constant 0 : i32
    return %c0_i32, %arg0 : i32, i32
  }
}

</mosaic_0001>

<bundles_post_ra>
// kernel: tpu_custom_call.1
= control target key start
LH: loop header
LB: loop body
LE: loop exit
PB: predicated region body
PF: predicated region fallthrough
CT: control target
= control target key end

     0   :  { %9 = vsyncpa [#allocation5], 0  ;;  %s141_s0 = inlined_call_operand.<no memory space> [shape: s32[1], index: 0, kind: input, shape index: {}]   ;;  %s142_s1 = inlined_call_operand.hbm [shape: f32[2,256], index: 1, kind: input, shape index: {}]   ;;  %s143_s2 = inlined_call_operand.vmem [shape: f32[1,256], index: 2, kind: input, shape index: {}]   ;;  %s144_s3 = inlined_call_operand.hbm [shape: f32[2,256], index: 3, kind: output, shape index: {}]  }
   0x1   :  { %10 = vsyncpa [#allocation6], 0  ;;  %s16_s14 = sshll.u32 %s142_s1, 4  ;;  %s110_s15 = smov [#allocation4]   ;;  %s17_s14 = int_to_ptr.hbm [resolvable:$true] %s16_s14 }
   0x2   :  { %s18_s16 = sshll.u32 %s110_s15, 4  ;;  %s19_s16 = int_to_ptr.vmem [resolvable:$true] %s18_s16 }
   0x3   :  { %21 = dma.hbm_to_vmem [thread:$0]  %s17_s14, 64, %s19_s16, [#allocation5]  }
   0x4   :  { %106 = dma.done.wait [#allocation5], 64  }
   0x5   :  { %107 = vsyncadd [#allocation5], 4294967232  ;;  %v29_v0 = vld [vmem:[%s143_s2] sm:$0x3]  ;;  %vm34_vm0 = vcmask 1041408   ;;  %s111_s18 = smov [#allocation7]  }
   0x6   :  { %v31_v1 = vperm.slane %v29_v0, 0  ;;  %v32_v2 = vperm.slane %v29_v0, 1  ;;  %v28_v3 = vld [vmem:[#allocation4] sm:$0xf]  ;;  %s44_s19 = sshll.u32 %s111_s18, 4  ;;  %s46_s21 = sshll.u32 %s144_s3, 4  ;;  %s45_s19 = int_to_ptr.vmem [resolvable:$true] %s44_s19  ;;  %s47_s21 = int_to_ptr.hbm [resolvable:$true] %s46_s21 }
   0x8   :  { %v33_v4 = vrot.slane %v32_v2, 6 }
   0xa   :  { %v35_v5 = vsel %vm34_vm0, %v31_v1, %v33_v4 }
   0xb   :  { %v37_v6 = vadd.f32 %v35_v5, %v28_v3 }
   0xd   :  { %38 = vst [vmem:[#allocation7] sm:$0xf] %v37_v6 }
   0xe   :  { %49 = dma.vmem_to_hbm [thread:$0]  %s45_s19, 64, %s47_s21, [#allocation6]  }
   0xf   :  { %108 = dma.done.wait [#allocation6], 64  }
  0x10   :  { %109 = vsyncadd [#allocation6], 4294967232 }
  0x11   :  { %54 = vsyncpa [#allocation5], 1 }
  0x12   :  { %55 = vsyncpa [#allocation6], 1 }

</bundles_post_ra>
